<compile_context>
chip_gen: v6e
topology: v6e:2x2x1
jax: 0.10.0
libtpu: 0.0.40
codegen_flags: <defaults>
</compile_context>

<pallas_src>
import math

import jax
import jax.numpy as jnp
import numpy as np
from jax.experimental import pallas as pl
from jax.experimental.pallas import tpu as pltpu


def _graph_conv_kernel(x_ref, nb_ref, w_ref, b_ref, out_ref):
    """One (batch, node-tile) pair per grid step.

    x_ref:   (1, Cp, N+1)   channels-first node features (row N = fill_invalid),
                            channels zero-padded to Cp (multiple of 8)
    nb_ref:  (1, K, TN)     int32 neighbour indices in [0, N]
    w_ref:   (O, K*Cp)      linear weight, column k*Cp + c
    b_ref:   (O, 1)         bias
    out_ref: (1, O, TN)     channels-first output tile (lane-dense in nodes)
    """
    x = x_ref[0]                      # [Cp, N+1]
    nb = nb_ref[0]                    # [K, TN]
    n_pad = x.shape[1]                # N + 1
    k_nbrs, tn = nb.shape

    # Row index along the node axis, broadcast over the TN lanes.
    iota = jax.lax.broadcasted_iota(jnp.int32, (n_pad, tn), 0)   # [N+1, TN]

    # K is a small static constant -> unrolled python loop; each step is a
    # transposed one-hot gather producing a [Cp, TN] block (node dim on lanes).
    pieces = []
    for k in range(k_nbrs):
        idx = nb[k:k + 1, :]                                     # [1, TN]
        onehot_t = (iota == idx).astype(x.dtype)                 # [N+1, TN]
        pieces.append(
            jnp.dot(x, onehot_t, preferred_element_type=jnp.float32))  # [Cp, TN]

    gathered_t = jnp.concatenate(pieces, axis=0)                 # [K*Cp, TN]

    # Single fused projection over the full K*Cp contraction dim.
    out = jnp.dot(w_ref[...], gathered_t,
                  preferred_element_type=jnp.float32)            # [O, TN]
    out_ref[0] = (out + b_ref[...]).astype(out_ref.dtype)


def _pick_node_tile(n_nodes):
    """Node tile: multiples of 128 when possible, otherwise the full extent."""
    if n_nodes % 256 == 0:
        return 256
    if n_nodes % 128 == 0:
        return 128
    return n_nodes


def regular_graph_conv(inp, neighbours, weight, bias, fill_invalid,
                       node_tile=None):
    """Pallas implementation of RegularGraphConv.forward (distances=None).

    inp:          [B, in_ch, N]    float32
    neighbours:   [B, N, K]        int, values in [0, N] (N selects fill_invalid)
    weight:       [out_ch, in_ch*K]
    bias:         [out_ch]
    fill_invalid: [1, in_ch, 1]
    returns:      [B, out_ch, N]
    """
    B, in_ch, N = inp.shape
    K = neighbours.shape[-1]
    out_ch = weight.shape[0]

    # --- glue: parameter / layout prep (plain JAX, all small) ---
    # Pad channels to a multiple of 8 so sublane offsets in-kernel stay aligned.
    c_pad = max(8, ((in_ch + 7) // 8) * 8)

    addition = jnp.broadcast_to(fill_invalid, (B, in_ch, 1))
    x = jnp.concatenate([inp, addition], axis=-1)                # [B, C, N+1]
    if c_pad != in_ch:
        x = jnp.pad(x, ((0, 0), (0, c_pad - in_ch), (0, 0)))     # [B, Cp, N+1]

    nb_t = jnp.transpose(neighbours.astype(jnp.int32), (0, 2, 1))  # [B, K, N]

    # weight[o, k*C + c] -> padded -> [O, K*Cp], column index k*Cp + c
    w = weight.reshape(out_ch, K, in_ch)
    if c_pad != in_ch:
        w = jnp.pad(w, ((0, 0), (0, 0), (0, c_pad - in_ch)))
    w = w.reshape(out_ch, K * c_pad).astype(jnp.float32)
    b2 = bias.reshape(out_ch, 1).astype(jnp.float32)

    TN = _pick_node_tile(N) if node_tile is None else node_tile
    assert N % TN == 0
    n_tiles = N // TN

    out = pl.pallas_call(
        _graph_conv_kernel,
        out_shape=jax.ShapeDtypeStruct((B, out_ch, N), inp.dtype),
        grid=(B, n_tiles),
        in_specs=[
            # full node range of one batch element, resident across node tiles
            pl.BlockSpec((1, c_pad, N + 1), lambda b, n: (b, 0, 0)),
            pl.BlockSpec((1, K, TN), lambda b, n: (b, 0, n)),
            pl.BlockSpec((out_ch, K * c_pad), lambda b, n: (0, 0)),
            pl.BlockSpec((out_ch, 1), lambda b, n: (0, 0)),
        ],
        out_specs=pl.BlockSpec((1, out_ch, TN), lambda b, n: (b, 0, n)),
        compiler_params=pltpu.CompilerParams(
            dimension_semantics=("parallel", "parallel")),
    )(x, nb_t, w, b2)

    return out                                                   # [B, out_ch, N]


def _reference(inp, neighbours, weight, bias, fill_invalid):
    """Pure-JAX transcription of the PyTorch forward for verification."""
    B = inp.shape[0]
    addition = jnp.broadcast_to(fill_invalid, (B,) + fill_invalid.shape[1:])
    x = jnp.concatenate([inp, addition], axis=-1)                # [B, C, N+1]
    outs = []
    for b in range(B):
        xb = x[b].T                                              # [N+1, C]
        nf = xb[neighbours[b]]                                   # [N, K, C]
        nf = nf.reshape(nf.shape[0], -1)                         # [N, K*C]
        ob = nf @ weight.T + bias                                # [N, O]
        outs.append(ob.T)                                        # [O, N]
    return jnp.stack(outs, axis=0)


def _run_case(key, B, in_ch, out_ch, N, K):
    k_inp, k_nb, k_w, k_b, k_fill = jax.random.split(key, 5)

    inp = jax.random.normal(k_inp, (B, in_ch, N), dtype=jnp.float32)
    neighbours = jax.random.randint(k_nb, (B, N, K), 0, N + 1, dtype=jnp.int32)

    # Deterministic parameter init mirroring the module's __init__:
    fan_in = in_ch * K
    w_bound = 1.0 / math.sqrt(fan_in)          # nn.Linear default bound
    weight = jax.random.uniform(k_w, (out_ch, in_ch * K), jnp.float32,
                                -w_bound, w_bound)
    bias = jax.random.uniform(k_b, (out_ch,), jnp.float32, -w_bound, w_bound)
    fill_bound = 1.0 / math.sqrt(1)            # fill_invalid.shape[0] == 1
    fill_invalid = jax.random.uniform(k_fill, (1, in_ch, 1), jnp.float32,
                                      -fill_bound, fill_bound)

    out = regular_graph_conv(inp, neighbours, weight, bias, fill_invalid)
    out = jax.block_until_ready(out)

    ref = _reference(inp, neighbours, weight, bias, fill_invalid)
    assert out.shape == (B, out_ch, N), out.shape
    np.testing.assert_allclose(np.asarray(out), np.asarray(ref),
                               rtol=1e-5, atol=1e-5)


if __name__ == "__main__":
    key = jax.random.PRNGKey(0)
    k0, k1 = jax.random.split(key)

    # Small shapes matching the module's intended usage (single node tile).
    _run_case(k0, B=2, in_ch=4, out_ch=8, N=16, K=5)
    # Larger node count to exercise the lane-aligned node-tiled path (TN=128).
    _run_case(k1, B=2, in_ch=4, out_ch=8, N=256, K=5)

    print("KERNEL_OK")
</pallas_src>

<mosaic_0001>
module attributes {stable_mosaic.version = 11 : i64} {
  func.func @_graph_conv_kernel(%arg0: i32, %arg1: i32, %arg2: memref<1x8x17xf32, #tpu.memory_space<vmem>>, %arg3: memref<1x5x16xi32, #tpu.memory_space<vmem>>, %arg4: memref<8x40xf32, #tpu.memory_space<vmem>>, %arg5: memref<8x1xf32, #tpu.memory_space<vmem>>, %arg6: memref<1x8x16xf32, #tpu.memory_space<vmem>>) attributes {dimension_semantics = [#tpu.dimension_semantics<parallel>, #tpu.dimension_semantics<parallel>], iteration_bounds = array<i64: 2, 1>, scalar_prefetch = 0 : i64, scratch_operands = 0 : i64, tpu.core_type = #tpu.core_type<tc>, window_params = [{transform_indices = @transform_0, window_bounds = array<i64: 1, 8, 17>}, {transform_indices = @transform_1, window_bounds = array<i64: 1, 5, 16>}, {pipeline_mode = #tpu.pipeline_mode<synchronous>, transform_indices = @transform_2, window_bounds = array<i64: 8, 40>}, {pipeline_mode = #tpu.pipeline_mode<synchronous>, transform_indices = @transform_3, window_bounds = array<i64: 8, 1>}, {transform_indices = @transform_4, window_bounds = array<i64: 1, 8, 16>}]} {
    %c0 = arith.constant 0 : index
    %c0_0 = arith.constant 0 : index
    %c0_1 = arith.constant 0 : index
    %0 = vector.load %arg2[%c0, %c0_0, %c0_1] : memref<1x8x17xf32, #tpu.memory_space<vmem>>, vector<1x8x17xf32>
    %1 = vector.shape_cast %0 : vector<1x8x17xf32> to vector<8x17xf32>
    %c0_2 = arith.constant 0 : index
    %c0_3 = arith.constant 0 : index
    %c0_4 = arith.constant 0 : index
    %2 = vector.load %arg3[%c0_2, %c0_3, %c0_4] : memref<1x5x16xi32, #tpu.memory_space<vmem>>, vector<1x5x16xi32>
    %3 = vector.shape_cast %2 : vector<1x5x16xi32> to vector<5x16xi32>
    %4 = tpu.iota {dimensions = array<i32: 0>} : vector<17x16xi32>
    %5 = vector.extract_strided_slice %3 {offsets = [0, 0], sizes = [1, 16], strides = [1, 1]} : vector<5x16xi32> to vector<1x16xi32>
    %6 = vector.broadcast %5 : vector<1x16xi32> to vector<17x16xi32>
    %7 = arith.cmpi eq, %4, %6 : vector<17x16xi32>
    %8 = arith.extui %7 : vector<17x16xi1> to vector<17x16xi32>
    %9 = arith.sitofp %8 : vector<17x16xi32> to vector<17x16xf32>
    %cst = arith.constant dense<0.000000e+00> : vector<8x16xf32>
    %10 = tpu.matmul %1, %9, %cst {dimension_numbers = #tpu.dot_dimension_numbers<[1], [0], [0], [1], [0, 0, 1, 1], [], []>} : vector<8x17xf32>, vector<17x16xf32>, vector<8x16xf32> -> vector<8x16xf32>
    %11 = vector.extract_strided_slice %3 {offsets = [1, 0], sizes = [1, 16], strides = [1, 1]} : vector<5x16xi32> to vector<1x16xi32>
    %12 = vector.broadcast %11 : vector<1x16xi32> to vector<17x16xi32>
    %13 = arith.cmpi eq, %4, %12 : vector<17x16xi32>
    %14 = arith.extui %13 : vector<17x16xi1> to vector<17x16xi32>
    %15 = arith.sitofp %14 : vector<17x16xi32> to vector<17x16xf32>
    %cst_5 = arith.constant dense<0.000000e+00> : vector<8x16xf32>
    %16 = tpu.matmul %1, %15, %cst_5 {dimension_numbers = #tpu.dot_dimension_numbers<[1], [0], [0], [1], [0, 0, 1, 1], [], []>} : vector<8x17xf32>, vector<17x16xf32>, vector<8x16xf32> -> vector<8x16xf32>
    %17 = vector.extract_strided_slice %3 {offsets = [2, 0], sizes = [1, 16], strides = [1, 1]} : vector<5x16xi32> to vector<1x16xi32>
    %18 = vector.broadcast %17 : vector<1x16xi32> to vector<17x16xi32>
    %19 = arith.cmpi eq, %4, %18 : vector<17x16xi32>
    %20 = arith.extui %19 : vector<17x16xi1> to vector<17x16xi32>
    %21 = arith.sitofp %20 : vector<17x16xi32> to vector<17x16xf32>
    %cst_6 = arith.constant dense<0.000000e+00> : vector<8x16xf32>
    %22 = tpu.matmul %1, %21, %cst_6 {dimension_numbers = #tpu.dot_dimension_numbers<[1], [0], [0], [1], [0, 0, 1, 1], [], []>} : vector<8x17xf32>, vector<17x16xf32>, vector<8x16xf32> -> vector<8x16xf32>
    %23 = vector.extract_strided_slice %3 {offsets = [3, 0], sizes = [1, 16], strides = [1, 1]} : vector<5x16xi32> to vector<1x16xi32>
    %24 = vector.broadcast %23 : vector<1x16xi32> to vector<17x16xi32>
    %25 = arith.cmpi eq, %4, %24 : vector<17x16xi32>
    %26 = arith.extui %25 : vector<17x16xi1> to vector<17x16xi32>
    %27 = arith.sitofp %26 : vector<17x16xi32> to vector<17x16xf32>
    %cst_7 = arith.constant dense<0.000000e+00> : vector<8x16xf32>
    %28 = tpu.matmul %1, %27, %cst_7 {dimension_numbers = #tpu.dot_dimension_numbers<[1], [0], [0], [1], [0, 0, 1, 1], [], []>} : vector<8x17xf32>, vector<17x16xf32>, vector<8x16xf32> -> vector<8x16xf32>
    %29 = vector.extract_strided_slice %3 {offsets = [4, 0], sizes = [1, 16], strides = [1, 1]} : vector<5x16xi32> to vector<1x16xi32>
    %30 = vector.broadcast %29 : vector<1x16xi32> to vector<17x16xi32>
    %31 = arith.cmpi eq, %4, %30 : vector<17x16xi32>
    %32 = arith.extui %31 : vector<17x16xi1> to vector<17x16xi32>
    %33 = arith.sitofp %32 : vector<17x16xi32> to vector<17x16xf32>
    %cst_8 = arith.constant dense<0.000000e+00> : vector<8x16xf32>
    %34 = tpu.matmul %1, %33, %cst_8 {dimension_numbers = #tpu.dot_dimension_numbers<[1], [0], [0], [1], [0, 0, 1, 1], [], []>} : vector<8x17xf32>, vector<17x16xf32>, vector<8x16xf32> -> vector<8x16xf32>
    %35 = tpu.concatenate %10, %16, %22, %28, %34 in 0 : vector<8x16xf32>, vector<8x16xf32>, vector<8x16xf32>, vector<8x16xf32>, vector<8x16xf32> -> vector<40x16xf32>
    %c0_9 = arith.constant 0 : index
    %c0_10 = arith.constant 0 : index
    %36 = vector.load %arg4[%c0_9, %c0_10] : memref<8x40xf32, #tpu.memory_space<vmem>>, vector<8x40xf32>
    %cst_11 = arith.constant dense<0.000000e+00> : vector<8x16xf32>
    %37 = tpu.matmul %36, %35, %cst_11 {dimension_numbers = #tpu.dot_dimension_numbers<[1], [0], [0], [1], [0, 0, 1, 1], [], []>} : vector<8x40xf32>, vector<40x16xf32>, vector<8x16xf32> -> vector<8x16xf32>
    %c0_12 = arith.constant 0 : index
    %c0_13 = arith.constant 0 : index
    %38 = vector.load %arg5[%c0_12, %c0_13] : memref<8x1xf32, #tpu.memory_space<vmem>>, vector<8x1xf32>
    %39 = vector.broadcast %38 : vector<8x1xf32> to vector<8x16xf32>
    %40 = arith.addf %37, %39 : vector<8x16xf32>
    %c0_14 = arith.constant 0 : index
    %c0_15 = arith.constant 0 : index
    %c0_16 = arith.constant 0 : index
    %41 = vector.load %arg6[%c0_14, %c0_15, %c0_16] : memref<1x8x16xf32, #tpu.memory_space<vmem>>, vector<1x8x16xf32>
    %42 = vector.shape_cast %41 : vector<1x8x16xf32> to vector<8x16xf32>
    %43 = vector.shape_cast %40 : vector<8x16xf32> to vector<1x8x16xf32>
    tpu.vector_store %arg6[%c0_14, %c0_15, %c0_16], %43 {strides = array<i32>} : memref<1x8x16xf32, #tpu.memory_space<vmem>>, vector<1x8x16xf32>,
    return
  }
  func.func @transform_0(%arg0: i32, %arg1: i32) -> (i32, i32, i32) {
    %c0_i32 = arith.constant 0 : i32
    %c0_i32_0 = arith.constant 0 : i32
    %c0_i32_1 = arith.constant 0 : i32
    return %arg0, %c0_i32, %c0_i32_0 : i32, i32, i32
  }
  func.func @transform_1(%arg0: i32, %arg1: i32) -> (i32, i32, i32) {
    %c0_i32 = arith.constant 0 : i32
    %c0_i32_0 = arith.constant 0 : i32
    return %arg0, %c0_i32, %arg1 : i32, i32, i32
  }
  func.func @transform_2(%arg0: i32, %arg1: i32) -> (i32, i32) {
    %c0_i32 = arith.constant 0 : i32
    %c0_i32_0 = arith.constant 0 : i32
    %c0_i32_1 = arith.constant 0 : i32
    return %c0_i32, %c0_i32_0 : i32, i32
  }
  func.func @transform_3(%arg0: i32, %arg1: i32) -> (i32, i32) {
    %c0_i32 = arith.constant 0 : i32
    %c0_i32_0 = arith.constant 0 : i32
    %c0_i32_1 = arith.constant 0 : i32
    return %c0_i32, %c0_i32_0 : i32, i32
  }
  func.func @transform_4(%arg0: i32, %arg1: i32) -> (i32, i32, i32) {
    %c0_i32 = arith.constant 0 : i32
    %c0_i32_0 = arith.constant 0 : i32
    return %arg0, %c0_i32, %arg1 : i32, i32, i32
  }
}

</mosaic_0001>

<bundles_post_ra>
// kernel: tpu_custom_call.1
= control target key start
LH: loop header
LB: loop body
LE: loop exit
PB: predicated region body
PF: predicated region fallthrough
CT: control target
= control target key end

     0   :  { %9 = vsyncpa [#allocation3], 0  ;;  %s1332_s0 = inlined_call_operand.vmem [shape: f32[2,8,17], index: 0, kind: input, shape index: {}]   ;;  %s1333_s1 = inlined_call_operand.vmem [shape: s32[2,5,16], index: 1, kind: input, shape index: {}]   ;;  %s1334_s2 = inlined_call_operand.vmem [shape: f32[8,40], index: 2, kind: input, shape index: {}]   ;;  %s1335_s3 = inlined_call_operand.vmem [shape: f32[8,1], index: 3, kind: input, shape index: {}]   ;;  %s1336_s4 = inlined_call_operand.hbm [shape: f32[2,8,16], index: 4, kind: output, shape index: {}]  }
   0x1   :  { %11 = vsyncpa [#allocation3 + $0x1], 0  ;;  %s1157_s15 = smov 0   ;;  %s1159_s16 = smov 0  }
   0x2   :  { %s1161_s17 = smov 0   ;;  %s1163_s18 = smov 0  }
   0x3   :  { %s1165_s19 = smov 0   ;;  %s1167_s20 = smov 0  }
   0x4 LB: > { %s857_s21 = sadd.s32 4294967295, %s1125_s20   ;;  %s858_s22 = sadd.s32 4294967294, %s1125_s20   ;;  %s1125_s20 = sphi %s1167_s20, %s17_s20   ;;  %s1121_s19 = sphi %s1165_s19, %s1343_s19   ;;  %s1117_s18 = sphi %s1163_s18, %s1342_s18   ;;  %s1113_s17 = sphi %s1161_s17, %s1341_s17   ;;  %s1109_s16 = sphi %s1159_s16, %s1340_s16   ;;  %s1105_s15 = sphi %s1157_s15, %s1339_s15  }
   0x5   : > { %s29_s23 = sadd.s32 1, %s1121_s19  ;;  %s134_s24 = sadd.s32 1, %s1113_s17 }
   0x6   : > { %p31_p0 = scmp.ge.s32.totalorder %s29_s23, 2  ;;  %p144_p1 = scmp.ne.s32.totalorder %s1113_s17, %s1109_s16 }
   0x7   : > { %p145_p2 = scmp.eq.s32.totalorder %s857_s21, 1  ;;  %p150_p3 = scmp.ne.s32.totalorder %s1109_s16, %s1105_s15 }
   0x8   : > { %s1345_s23 = smov (%p31_p0, %s29_s23), 0  ;;  %p151_p5 = scmp.eq.s32.totalorder %s858_s22, 1 }
   0x9   : > { %p1197_p4 = por %p145_p2, %p144_p1  ;;  %s129_s26 = ssub.s32 %s1121_s19, %s1345_s23 }
   0xa   : > { %p861_p6 = scmp.ge.s32.totalorder %s1125_s20, 1  ;;  %p132_p7 = scmp.eq.s32.totalorder %s129_s26, 0 }
   0xb   : > { %p1204_p8 = por %p151_p5, %p150_p3  ;;  %p192_p9 = scmp.lt.s32.totalorder %s1125_s20, 3 }
   0xc   : > { %s1210_s28 = scalar_select %p132_p7, %s1113_s17, %s134_s24  }
   0xd   : > { %p193_p10 = pnand %p861_p6, %p192_p9 }
   0xe   : > { %p224_p11 = scmp.lt.s32.totalorder (!%p193_p10), %s1117_s18, 1  ;;  %s221_s21 = sand.u32 (!%p193_p10), 1, %s1109_s16  }
   0xf   : > { %196 = sbr.rel (%p193_p10) target bundleno = 457 (0x1c9), region = 36  ;;  %s862_s22 = sshll.u32 (!%p193_p10), %s221_s21, 3 }
  0x10   : > { %s902_s24 = sshll.u32 (!%p193_p10), %s1117_s18, 7  ;;  %s223_s26 = scalar_lea.vmem (!%p193_p10), [#allocation2], %s862_s22 }
  0x11   : > { %s1292_s6 = scalar_lea.hbm (!%p193_p10), %s1336_s4, %s902_s24 }
  0x14   : > { %v237_v0 = vlaneseq  ;;  %v1127_v1 = vmov 0.0   ;;  %s225_s29 = scalar_select %p224_p11, %s1117_s18, 1  ;;  %vm1128_vm0 = vmmov 0   ;;  %vm258_vm1 = vcmask 1040384   ;;  %v677_v23 = vld [vmem:[%s1335_s3] sm:$0xff] }
  0x15   : > { %931 = vmatprep.subr.mxu0 %v1127_v1  ;;  %940 = vmatprep.subr.mxu1 %v1127_v1  ;;  %v1129_v17 = vmov 1.0   ;;  %vm254_vm9 = vcmask 138240   ;;  %v1130_v24 = vmov 0   ;;  %v676_v35 = vld [vmem:[%s1334_s2] sm:$0xff]  ;;  %s1131_s18 = smov [#allocation2]  }
  0x16   : > { %v1216_v2 = vshrl.u32 %v237_v0, 7  ;;  %937 = vmatprep.mubr.msk.f32.mxu0 %vm1128_vm0, %v1127_v1  ;;  %946 = vmatprep.mubr.msk.f32.mxu1 %vm1128_vm0, %v1127_v1  ;;  %s863_s30 = sshll.u32 %s225_s29, 3  ;;  %s774_s29 = sshll.u32 %s223_s26, 4  ;;  %s775_s29 = int_to_ptr.vmem [resolvable:$true] %s774_s29 }
  0x17   : > { %s234_s7 = scalar_lea.vmem %s1333_s1, %s863_s30  ;;  %s227_s10 = scalar_lea.vmem %s1332_s0, %s863_s30  ;;  %1048 = vset.pattern.permute.xlu0 %v1130_v24 }
  0x18   : > { %v243_v3 = vsub.s32 0, %v1216_v2  ;;  %v334_v4 = vsub.s32 1, %v1216_v2  ;;  %v240_v5 = vadd.s32 16, %v1216_v2  ;;  %v420_v6 = vsub.s32 2, %v1216_v2  ;;  %v236_v8 = vld [vmem:[%s234_s7] sm:$0x1f]  ;;  %680 = vperm.xlu0 %1048, %v677_v23  }
  0x19   : > { %v506_v7 = vsub.s32 3, %v1216_v2  ;;  %v239_v9 = vadd.s32 8, %v1216_v2  ;;  %v592_v14 = vsub.s32 4, %v1216_v2  ;;  %v235_v18 = vld [vmem:[%s227_s10] sm:$0xff]  ;;  %s760_s7 = scalar_lea.sflag [#allocation3], %s221_s21  ;;  %s1049_s8 = scalar_lea.vmem %s775_s29, 128 }
  0x1a   : > { %v244_v10 = vrot.slane %v236_v8, %v243_v3  ;;  %v335_v11 = vrot.slane %v236_v8, %v334_v4  ;;  %v421_v12 = vrot.slane %v236_v8, %v420_v6  ;;  %p1050_p12 = scmp.ne.s32.totalorder %s775_s29, %s1049_s8  ;;  %s1053_s9 = sshll.u32 %s1131_s18, 4  ;;  %s1054_s9 = int_to_ptr.vmem [resolvable:$false] %s1053_s9 }
  0x1b   : > { %v507_v13 = vrot.slane %v236_v8, %v506_v7  ;;  %v593_v19 = vrot.slane %v236_v8, %v592_v14  ;;  %s1055_s10 = scalar_lea.vmem %s1054_s9, 256  ;;  %p1056_p1 = scmp.lt.s32.totalorder %s775_s29, %s1054_s9 }
  0x1c   : > { %vm247_vm2 = vcmp.eq.s32.totalorder %v240_v5, %v244_v10  ;;  %vm338_vm3 = vcmp.eq.s32.totalorder %v240_v5, %v335_v11  ;;  %vm246_vm4 = vcmp.eq.s32.totalorder %v239_v9, %v244_v10  ;;  %vm337_vm5 = vcmp.eq.s32.totalorder %v239_v9, %v335_v11  ;;  %p1051_p13 = pnand %p1050_p12, %p1197_p4  ;;  %p1057_p2 = scmp.lt.s32.totalorder %s1055_s10, %s1049_s8 }
  0x1d   : > { %v867_v15 = vsel %vm247_vm2, 1.0, %v1127_v1  ;;  %v874_v16 = vsel %vm338_vm3, 1.0, %v1127_v1  ;;  %vm424_vm6 = vcmp.eq.s32.totalorder %v240_v5, %v421_v12  ;;  %vm245_vm7 = vcmp.eq.s32.totalorder %v1216_v2, %v244_v10 }
  0x1e   : > { %932 = vmatpush3.msk.msra.mxu0 %vm258_vm1, %v867_v15  ;;  %941 = vmatpush3.msk.msra.mxu1 %vm258_vm1, %v874_v16  ;;  %vm336_vm8 = vcmp.eq.s32.totalorder %v1216_v2, %v335_v11  ;;  %v881_v20 = vsel %vm424_vm6, 1.0, %v1127_v1  ;;  %vm510_vm10 = vcmp.eq.s32.totalorder %v240_v5, %v507_v13  ;;  %vm423_vm11 = vcmp.eq.s32.totalorder %v239_v9, %v421_v12  ;;  %p1052_p0 = pneg %p1051_p13  ;;  %p1058_p3 = por %p1057_p2, %p1056_p1 }
  0x1f   : > { %933 = vmatprep.subr.mxu0 %v1127_v1  ;;  %942 = vmatprep.subr.mxu1 %v1127_v1  ;;  %v888_v21 = vsel %vm510_vm10, 1.0, %v1127_v1  ;;  %vm596_vm12 = vcmp.eq.s32.totalorder %v240_v5, %v593_v19  ;;  %vm422_vm13 = vcmp.eq.s32.totalorder %v1216_v2, %v421_v12  ;;  %vm509_vm14 = vcmp.eq.s32.totalorder %v239_v9, %v507_v13 }
  0x20   : > { %934 = vmatpush3.msk.msra.mxu0 %vm246_vm4, %v1129_v17  ;;  %943 = vmatpush3.msk.msra.mxu1 %vm337_vm5, %v1129_v17  ;;  %v895_v22 = vsel %vm596_vm12, 1.0, %v1127_v1  ;;  %vm595_vm15 = vcmp.eq.s32.totalorder %v239_v9, %v593_v19  ;;  %vm508_vm2 = vcmp.eq.s32.totalorder %v1216_v2, %v507_v13  ;;  %vm594_vm3 = vcmp.eq.s32.totalorder %v1216_v2, %v593_v19  ;;  %p1059_p5 = pnand %p1058_p3, %p1052_p0 }
  0x21   : > { %935 = vmatprep.subr.mxu0 %v1127_v1  ;;  %944 = vmatprep.subr.mxu1 %v1127_v1 }
  0x22   : > { %936 = vmatpush3.msk.msra.mxu0 %vm245_vm7, %v1129_v17  ;;  %945 = vmatpush3.msk.msra.mxu1 %vm336_vm8, %v1129_v17 }
  0x23   : > { %938 = vmatmul.mubr.msk.f32.vlgmr.msra.gmra.mxu0 %vm254_vm9, %v235_v18  ;;  %949 = vmatprep.subr.mxu0 %v1127_v1 }
  0x24   : > { %950 = vmatpush3.msk.msra.mxu0 %vm258_vm1, %v881_v20  ;;  %955 = vmatprep.mubr.msk.f32.mxu0 %vm1128_vm0, %v1127_v1 }
  0x25   : > { %951 = vmatprep.subr.mxu0 %v1127_v1  ;;  %958 = vmatprep.subr.mxu1 %v1127_v1 }
  0x26   : > { %952 = vmatpush3.msk.msra.mxu0 %vm423_vm11, %v1129_v17  ;;  %947 = vmatmul.mubr.msk.f32.vlgmr.msra.gmra.mxu1 %vm254_vm9, %v235_v18 }
  0x27   : > { %953 = vmatprep.subr.mxu0 %v1127_v1  ;;  %959 = vmatpush3.msk.msra.mxu1 %vm258_vm1, %v888_v21 }
  0x28   : > { %954 = vmatpush3.msk.msra.mxu0 %vm422_vm13, %v1129_v17  ;;  %960 = vmatprep.subr.mxu1 %v1127_v1 }
  0x29   : > { %956 = vmatmul.mubr.msk.f32.vlgmr.msra.gmra.mxu0 %vm254_vm9, %v235_v18  ;;  %967 = vmatprep.subr.mxu0 %v1127_v1 }
  0x2a   : > { %968 = vmatpush3.msk.msra.mxu0 %vm258_vm1, %v895_v22  ;;  %961 = vmatpush3.msk.msra.mxu1 %vm509_vm14, %v1129_v17  ;;  %vm757_vm1 = vcmask 130048  }
  0x2b   : > { %969 = vmatprep.subr.mxu0 %v1127_v1  ;;  %962 = vmatprep.subr.mxu1 %v1127_v1 }
  0x2c   : > { %970 = vmatpush3.msk.msra.mxu0 %vm595_vm15, %v1129_v17  ;;  %963 = vmatpush3.msk.msra.mxu1 %vm508_vm2, %v1129_v17 }
  0x2d   : > { %971 = vmatprep.subr.mxu0 %v1127_v1  ;;  %964 = vmatprep.mubr.msk.f32.mxu1 %vm1128_vm0, %v1127_v1 }
  0x2e   : > { %972 = vmatpush3.msk.msra.mxu0 %vm594_vm3, %v1129_v17  ;;  %973 = vmatprep.mubr.msk.f32.mxu0 %vm1128_vm0, %v1127_v1 }
  0x2f   : > { %965 = vmatmul.mubr.msk.f32.vlgmr.msra.gmra.mxu1 %vm254_vm9, %v235_v18  ;;  %974 = vmatmul.mubr.msk.f32.vlgmr.msra.gmra.mxu0 %vm254_vm9, %v235_v18 }
  0x30   : > { %976 = vmatprep.subr.mxu1 %v1127_v1  ;;  %986 = vmatprep.mubr.msk.f32.mxu1 %vm1128_vm0, %v1127_v1  ;;  %vm683_vm0 = vcmask 326656  }
  0x93   : > { %v681_v36 = vpop.permute.xlu0 %680 }
  0xe3   : > { %v328_v25 = vpop.f32.mrf.mxu0 }
  0xe5   : > { %v939_v26 = vpop.f32.mrf.mxu0 }
  0xe6   : > { %v414_v27 = vpop.f32.mrf.mxu1 }
  0xe8   : > { %v948_v28 = vpop.f32.mrf.mxu1 }
  0xe9   : > { %v500_v29 = vpop.f32.mrf.mxu0 }
  0xeb   : > { %v957_v30 = vpop.f32.mrf.mxu0 }
  0xef   : > { %v586_v31 = vpop.f32.mrf.mxu1  ;;  %v672_v32 = vpop.f32.mrf.mxu0 }
  0xf0   : > { %977 = vmatpush3.msra.mxu1 %v672_v32 }
  0xf1   : > { %v966_v33 = vpop.f32.mrf.mxu1  ;;  %v975_v34 = vpop.f32.mrf.mxu0  ;;  %978 = vmatprep.subr.mxu1 %v1127_v1 }
  0xf2   : > { %979 = vmatpush3.msra.mxu1 %v586_v31 }
  0xf3   : > { %980 = vmatprep.subr.mxu1 %v1127_v1 }
  0xf4   : > { %981 = vmatpush3.msra.mxu1 %v500_v29 }
  0xf5   : > { %982 = vmatprep.subr.mxu1 %v1127_v1 }
  0xf6   : > { %983 = vmatpush3.msra.mxu1 %v414_v27 }
  0xf7   : > { %984 = vmatprep.subr.mxu1 %v1127_v1 }
  0xf8   : > { %985 = vmatpush3.msra.mxu1 %v328_v25 }
  0xf9   : > { %987 = vmatmul.mubr.msk.f32.vlgmr.msra.gmra.mxu1 %vm683_vm0, %v676_v35 }
 0x1b9   : > { %v753_v37 = vpop.f32.mrf.mxu1 }
 0x1ba   : > { %v754_v38 = vadd.f32 %v753_v37, %v681_v36 }
 0x1bb   : > { %v988_v39 = vpop.f32.mrf.mxu1 }
 0x1bc   : > { %758 = vst.msk [vmem:[%s223_s26] sm:$0xff] %vm757_vm1, %v754_v38 }
 0x1bd   : > { %1062 = shalt.err (!%p1059_p5)
}
 0x1be   : > { %s1063_s11 = scalar_lea.hbm %s1292_s6, 128  ;;  %s1067_s14 = scalar_lea.hbm %s1336_s4, 256 }
 0x1bf   : > { %p1064_p6 = scmp.ne.s32.totalorder %s1292_s6, %s1063_s11  ;;  %p1068_p10 = scmp.lt.s32.totalorder %s1292_s6, %s1336_s4 }
 0x1c0   : > { %p1069_p11 = scmp.lt.s32.totalorder %s1067_s14, %s1063_s11 }
 0x1c1   : > { %p1065_p7 = pnand %p1064_p6, %p1197_p4 }
 0x1c2   : > { %p1070_p12 = por %p1069_p11, %p1068_p10 }
 0x1c3   : > { %p1066_p9 = pneg %p1065_p7 }
 0x1c5   : > { %p1071_p13 = pnand %p1070_p12, %p1066_p9 }
 0x1c7   : > { %1074 = shalt.err (!%p1071_p13)
}
 0x1c8   : > { %989 = dma.vmem_to_hbm [thread:$0]  (%p1197_p4), %s775_s29, 128, %s1292_s6, %s760_s7  }
 0x1c9 PF: > { %p995_p0 = scmp.ge.s32.totalorder %s1125_s20, 2  ;;  %s786_s24 = sand.u32 1, %s1105_s15  }
 0x1ca   : > { %s787_s26 = scalar_lea.sflag [#allocation3], %s786_s24 }
 0x1cb   : > { %p992_p1 = pnand %p995_p0, %p1204_p8 }
 0x1cd   : > { %p993_p2 = pneg %p992_p1 }
 0x1cf   : > { %1100 = dma.done.wait (%p993_p2), %s787_s26, 128  }
 0x1d0   : > { %1102 = vsyncadd (%p993_p2), %s787_s26, 4294967168  ;;  %s17_s20 = sadd.s32 1, %s1125_s20   ;;  %s1339_s15 = smov %s1109_s16 }
 0x1d1   : > { %p14_p3 = scmp.ge.s32.totalorder %s17_s20, 4   ;;  %s1340_s16 = smov %s1113_s17 }
 0x1d2   : > { %s1341_s17 = smov %s1210_s28  ;;  %s1342_s18 = smov %s1121_s19 }
 0x1d3   : > { %s1343_s19 = smov %s1345_s23  ;;  %16 = sbr.rel (!%p14_p3) target bundleno = 4 (0x4), region = 74 }
 0x1d8   :  { %792 = vsyncpa [#allocation3], 1 }
 0x1d9   :  { %794 = vsyncpa [#allocation3 + $0x1], 1 }

</bundles_post_ra>
